<compile_context>
chip_gen: v6e
topology: v6e:2x2x1
jax: 0.10.0
libtpu: 0.0.40
codegen_flags: <defaults>
</compile_context>

<pallas_src>
from typing import NamedTuple

import numpy as np
import jax
import jax.numpy as jnp
from jax.experimental import pallas as pl
from jax.experimental.pallas import tpu as pltpu

NEG_SLOPE = 0.01                      # torch.nn.LeakyReLU default
_SINGLE_BUFFER_W_BYTES = 4 * 1024 * 1024


def _cdiv(a, b):
    return -(-a // b)


def _round_up(v, m):
    return _cdiv(v, m) * m


def _balanced_tile(size, cap):
    """Largest 128-multiple tile <= cap that minimizes padding of `size`
    (`size` must already be a multiple of 128)."""
    cap = max(128, (cap // 128) * 128)
    if size <= cap:
        return size
    g = _cdiv(size, cap)
    return _round_up(_cdiv(size, g), 128)


def _vmem_capacity_bytes():
    try:
        info = pltpu.get_tpu_info()
        for name in ("vmem_capacity_bytes", "vmem_bytes", "vmem_size_bytes"):
            v = getattr(info, name, None)
            if v:
                return int(v)
    except Exception:
        pass
    return 64 * 1024 * 1024           # conservative: v7x per-TensorCore VMEM


# ---------------------------------------------------------------------------
# Kernels:   out = leaky_relu(x @ W + bias) * scale + shift
# p_ref rows: 0 = bias, 1 = scale, 2 = shift (rows 3..7 are padding).
# ---------------------------------------------------------------------------
def _epilogue(y, p_ref, out_dtype):
    y = y + p_ref[0:1, :]
    y = jnp.where(y > 0, y, NEG_SLOPE * y)              # LeakyReLU
    return (y * p_ref[1:2, :] + p_ref[2:3, :]).astype(out_dtype)


def _fc_kernel(x_ref, w_ref, p_ref, o_ref):
    # Whole contraction in one MXU call; x is cast on the fly (no HBM copy).
    a = x_ref[...].astype(w_ref.dtype)
    y = jnp.dot(a, w_ref[...], preferred_element_type=jnp.float32)
    o_ref[...] = _epilogue(y, p_ref, o_ref.dtype)


def _fc_kernel_ksplit_f32(x_ref, w_ref, p_ref, o_ref):
    # Split-K, f32 output: accumulate straight into the resident output block
    # (saves tb*tn*4 B of VMEM and a final copy).
    k = pl.program_id(2)

    @pl.when(k == 0)
    def _():
        o_ref[...] = jnp.zeros_like(o_ref)

    a = x_ref[...].astype(w_ref.dtype)
    o_ref[...] += jnp.dot(a, w_ref[...], preferred_element_type=jnp.float32)

    @pl.when(k == pl.num_programs(2) - 1)
    def _():
        o_ref[...] = _epilogue(o_ref[...], p_ref, o_ref.dtype)


def _fc_kernel_ksplit_acc(x_ref, w_ref, p_ref, o_ref, acc_ref):
    # Split-K with a narrow output dtype: f32 VMEM accumulator.
    k = pl.program_id(2)

    @pl.when(k == 0)
    def _():
        acc_ref[...] = jnp.zeros_like(acc_ref)

    a = x_ref[...].astype(w_ref.dtype)
    acc_ref[...] += jnp.dot(a, w_ref[...], preferred_element_type=jnp.float32)

    @pl.when(k == pl.num_programs(2) - 1)
    def _():
        o_ref[...] = _epilogue(acc_ref[...], p_ref, o_ref.dtype)


# ---------------------------------------------------------------------------
# One-time parameter preparation + tile plan
# ---------------------------------------------------------------------------
class FcPlan(NamedTuple):
    in_dim: int
    out_dim: int
    kpad: int
    npad: int
    tk: int
    tn: int
    tb_max: int
    vmem_cap: int
    w: jax.Array          # (kpad, npad), compute dtype, zero padded
    params: jax.Array     # (8, npad) f32: rows 0=bias, 1=scale, 2=shift


def prepare_fc_block(w, b, scale=None, shift=None, *,
                     compute_dtype=jnp.bfloat16,
                     tb_max=512, tk_max=1024, tn_max=1024,
                     vmem_budget_bytes=None):
    """Cast/pad W, pack bias/scale/shift and pick tiles — done once, not per call."""
    K, N = w.shape
    cdtype = np.dtype(w.dtype if compute_dtype is None else compute_dtype)
    wsz = cdtype.itemsize
    xsz = osz = 4                     # plan for worst-case f32 activations

    cap = _vmem_capacity_bytes()
    budget = vmem_budget_bytes
    if budget is None:
        # <=40 MiB working set on 128 MiB parts, <=32 MiB on v7x (64 MiB).
        budget = min(cap // 2, 40 << 20)

    Kp = _round_up(K, 128)
    Np = _round_up(N, 128)
    tb = max(128, (tb_max // 128) * 128)

    def footprint(tb_, tk_, tn_, w_bufs, acc_bytes):
        return (2 * tb_ * tk_ * xsz          # x, double-buffered
                + w_bufs * tk_ * tn_ * wsz   # weight block(s)
                + 2 * tb_ * tn_ * osz        # output, double-buffered
                + 2 * 8 * tn_ * 4            # packed params
                + acc_bytes)

    w_bufs_res = 1 if Kp * Np * wsz > _SINGLE_BUFFER_W_BYTES else 2
    if footprint(tb, Kp, Np, w_bufs_res, 0) <= budget:
        # Whole (padded) weight stays VMEM-resident; no K split.
        tk, tn, Kpad, Npad = Kp, Np, Kp, Np
    else:
        # Stream the weight: balanced tiles keep padding ~128-granular.
        # Shrink tn -> tk -> tb (tb last: it sets how often W is re-streamed).
        tk = _balanced_tile(Kp, tk_max)
        tn = _balanced_tile(Np, tn_max)
        while footprint(tb, tk, tn, 2, tb * tn * 4) > budget:
            if tn > 128:
                tn = _balanced_tile(Np, max(128, ((tn // 2) // 128) * 128))
            elif tk > 128:
                tk = _balanced_tile(Kp, max(128, ((tk // 2) // 128) * 128))
            elif tb > 128:
                tb = max(128, ((tb // 2) // 128) * 128)
            else:
                break                 # minimal tiles; vmem_limit adds headroom
        Kpad = tk * _cdiv(Kp, tk)
        Npad = tn * _cdiv(Np, tn)

    # ---- heavy data prep happens exactly once --------------------------
    wc = jnp.asarray(w).astype(cdtype)
    if (Kpad, Npad) != (K, N):
        wc = jnp.pad(wc, ((0, Kpad - K), (0, Npad - N)))

    params = jnp.zeros((8, Npad), jnp.float32)
    params = params.at[0, :N].set(jnp.asarray(b, jnp.float32))
    params = params.at[1, :N].set(
        jnp.ones((N,), jnp.float32) if scale is None
        else jnp.asarray(scale, jnp.float32))
    params = params.at[2, :N].set(
        jnp.zeros((N,), jnp.float32) if shift is None
        else jnp.asarray(shift, jnp.float32))

    return FcPlan(K, N, Kpad, Npad, tk, tn, tb, cap, wc, params)


# ---------------------------------------------------------------------------
# Forward
# ---------------------------------------------------------------------------
def fc_block_apply(x, plan):
    """Fused forward:  leaky_relu(x @ W + b) * scale + shift  (eval mode)."""
    B, K = x.shape
    if K != plan.in_dim:
        raise ValueError("input feature dim does not match the prepared plan")
    N, Kpad, Npad = plan.out_dim, plan.kpad, plan.npad

    out_dtype = x.dtype
    xsz = np.dtype(x.dtype).itemsize
    osz = np.dtype(out_dtype).itemsize
    wsz = np.dtype(plan.w.dtype).itemsize

    tk, tn = plan.tk, plan.tn
    Bp0 = _round_up(B, 128)
    tb = _balanced_tile(Bp0, plan.tb_max)
    gi, gj, gk = _cdiv(Bp0, tb), _cdiv(Npad, tn), _cdiv(Kpad, tk)

    # Expose >=2 "parallel" grid blocks so both v7x TensorCores get work
    # (a single harmless extra grid step on 1-core parts).
    if gi == 1 and gj == 1:
        if Bp0 >= 256 and Bp0 % 256 == 0:
            tb = Bp0 // 2
        elif Npad >= 256 and Npad % 256 == 0:
            tn = Npad // 2
        gi, gj = _cdiv(Bp0, tb), _cdiv(Npad, tn)
    Bp = tb * gi

    # Pad the activation in its own dtype only when needed; the compute-dtype
    # cast happens inside the kernel (no extra HBM copy of x).
    xp = x if (Bp, Kpad) == (B, K) else jnp.pad(x, ((0, Bp - B), (0, Kpad - K)))

    w_constant = (gj == 1 and gk == 1)           # W block index never changes
    w_single = w_constant and tk * tn * wsz > _SINGLE_BUFFER_W_BYTES
    use_acc = (gk > 1) and (out_dtype != jnp.float32)

    # Explicit scoped-VMEM limit from the actual footprint (+ compiler-scratch
    # headroom): the defaults are too small for the resident path on v5e and
    # too close to physical VMEM on v7x.
    fp = (2 * tb * tk * xsz
          + (1 if w_single else 2) * tk * tn * wsz
          + 2 * tb * tn * osz
          + 2 * 8 * tn * 4
          + (tb * tn * 4 if use_acc else 0))
    vmem_limit = max(fp + (8 << 20), 24 << 20)
    vmem_limit = int(min(vmem_limit,
                         max(plan.vmem_cap - (4 << 20), fp + (2 << 20))))

    cost = pl.CostEstimate(
        flops=2 * Bp * Kpad * Npad,
        transcendentals=0,
        bytes_accessed=int(Bp * Kpad * xsz
                           + (1 if w_constant else gi) * Kpad * Npad * wsz
                           + Bp * Npad * osz + 8 * Npad * 4),
    )

    if gk == 1:
        kernel, scratch = _fc_kernel, []
    elif not use_acc:
        kernel, scratch = _fc_kernel_ksplit_f32, []
    else:
        kernel, scratch = _fc_kernel_ksplit_acc, [pltpu.VMEM((tb, tn), jnp.float32)]

    w_kwargs = {"pipeline_mode": pl.Buffered(1)} if w_single else {}

    out = pl.pallas_call(
        kernel,
        out_shape=jax.ShapeDtypeStruct((Bp, Npad), out_dtype),
        grid_spec=pltpu.PrefetchScalarGridSpec(
            num_scalar_prefetch=0,
            grid=(gi, gj, gk),
            in_specs=[
                pl.BlockSpec((tb, tk), lambda i, j, k: (i, k)),
                pl.BlockSpec((tk, tn), lambda i, j, k: (k, j), **w_kwargs),
                pl.BlockSpec((8, tn), lambda i, j, k: (0, j)),
            ],
            out_specs=pl.BlockSpec((tb, tn), lambda i, j, k: (i, j)),
            scratch_shapes=scratch,
        ),
        compiler_params=pltpu.CompilerParams(
            dimension_semantics=("parallel", "parallel", "arbitrary"),
            vmem_limit_bytes=vmem_limit,
        ),
        cost_estimate=cost,
    )(xp, plan.w, plan.params)

    return out[:B, :N]


def _reference(x, w, b, scale, shift):
    y = x @ w + b
    y = jnp.where(y > 0, y, NEG_SLOPE * y)
    return y * scale + shift


class FcBlock:
    """JAX/Pallas equivalent of the PyTorch Fc_block (eval semantics)."""

    def __init__(self, in_dim, out_dim, batch_norm, key,
                 compute_dtype=jnp.bfloat16):
        self.in_dim, self.out_dim, self.batch_norm = in_dim, out_dim, batch_norm
        k_w, k_b = jax.random.split(key)
        # nn.Linear-style U(-1/sqrt(in), 1/sqrt(in)) init; torch stores W as
        # (out, in) — kept transposed here for x @ W.
        bound = 1.0 / float(in_dim) ** 0.5
        self.w = jax.random.uniform(k_w, (in_dim, out_dim), jnp.float32,
                                    -bound, bound)
        self.b = jax.random.uniform(k_b, (out_dim,), jnp.float32, -bound, bound)
        if batch_norm:
            gamma = jnp.ones((out_dim,), jnp.float32)
            beta = jnp.zeros((out_dim,), jnp.float32)
            running_mean = jnp.zeros((out_dim,), jnp.float32)
            running_var = jnp.ones((out_dim,), jnp.float32)
            eps = 1e-5
            self.scale = gamma / jnp.sqrt(running_var + eps)
            self.shift = beta - running_mean * self.scale
        else:
            self.scale = jnp.ones((out_dim,), jnp.float32)   # eval Dropout = id
            self.shift = jnp.zeros((out_dim,), jnp.float32)
        # Heavy prep (cast/pad W, pack bias/scale/shift, tile plan) ONCE here.
        self.plan = prepare_fc_block(self.w, self.b, self.scale, self.shift,
                                     compute_dtype=compute_dtype)

    def __call__(self, x):
        return fc_block_apply(x, self.plan)


if __name__ == "__main__":
    key = jax.random.PRNGKey(0)
    k_x, k_p1, k_p2, k_x2, k_p3, k_x3, k_w3, k_b3 = jax.random.split(key, 8)

    # --- small shapes (resident-weight path) -------------------------------
    B, in_dim, out_dim = 16, 32, 64
    x = jax.random.normal(k_x, (B, in_dim), jnp.float32)

    # batch_norm=True, bf16 compute (f32 accumulation)
    blk_bn = FcBlock(in_dim, out_dim, batch_norm=True, key=k_p1)
    out_bn = jax.block_until_ready(blk_bn(x))
    ref_bn = _reference(x, blk_bn.w, blk_bn.b, blk_bn.scale, blk_bn.shift)
    assert out_bn.shape == (B, out_dim)
    assert jnp.allclose(out_bn, ref_bn, atol=2e-2, rtol=2e-2)

    # batch_norm=True, full f32 compute — tight tolerance
    blk_bn32 = FcBlock(in_dim, out_dim, batch_norm=True, key=k_p1,
                       compute_dtype=None)
    out_bn32 = jax.block_until_ready(blk_bn32(x))
    ref_bn32 = _reference(x, blk_bn32.w, blk_bn32.b, blk_bn32.scale,
                          blk_bn32.shift)
    assert jnp.allclose(out_bn32, ref_bn32, atol=1e-5, rtol=1e-5)

    # batch_norm=False (Dropout, eval = identity), f32
    blk_do = FcBlock(in_dim, out_dim, batch_norm=False, key=k_p2,
                     compute_dtype=None)
    out_do = jax.block_until_ready(blk_do(x))
    ref_do = _reference(x, blk_do.w, blk_do.b, blk_do.scale, blk_do.shift)
    assert out_do.shape == (B, out_dim)
    assert jnp.allclose(out_do, ref_do, atol=1e-5, rtol=1e-5)

    # ragged, non-128-aligned shapes — exercises the pad/slice path
    Br, Kr, Nr = 13, 20, 50
    xr = jax.random.normal(k_x2, (Br, Kr), jnp.float32)
    blk_r = FcBlock(Kr, Nr, batch_norm=True, key=k_p3, compute_dtype=None)
    out_r = jax.block_until_ready(blk_r(xr))
    ref_r = _reference(xr, blk_r.w, blk_r.b, blk_r.scale, blk_r.shift)
    assert out_r.shape == (Br, Nr)
    assert jnp.allclose(out_r, ref_r, atol=1e-5, rtol=1e-5)

    # --- force the tiled / split-K path with a tiny artificial VMEM budget --
    Bt, Kt, Nt = 160, 384, 256
    xt = jax.random.normal(k_x3, (Bt, Kt), jnp.float32)
    bound = 1.0 / float(Kt) ** 0.5
    wt = jax.random.uniform(k_w3, (Kt, Nt), jnp.float32, -bound, bound)
    bt = jax.random.uniform(k_b3, (Nt,), jnp.float32, -bound, bound)
    ones_n, zeros_n = jnp.ones((Nt,), jnp.float32), jnp.zeros((Nt,), jnp.float32)

    # f32 output -> split-K accumulating directly into the output block
    plan_f32 = prepare_fc_block(wt, bt, compute_dtype=None,
                                vmem_budget_bytes=1 << 20)
    out_t32 = jax.block_until_ready(fc_block_apply(xt, plan_f32))
    ref_t = _reference(xt, wt, bt, ones_n, zeros_n)
    assert out_t32.shape == (Bt, Nt)
    assert jnp.allclose(out_t32, ref_t, atol=1e-4, rtol=1e-4)

    # bf16 activations + bf16 output -> split-K kernel with f32 scratch acc
    plan_bf16 = prepare_fc_block(wt, bt, compute_dtype=jnp.bfloat16,
                                 vmem_budget_bytes=1 << 20)
    xt_bf16 = xt.astype(jnp.bfloat16)
    out_tb = jax.block_until_ready(fc_block_apply(xt_bf16, plan_bf16))
    ref_tb = _reference(xt_bf16.astype(jnp.float32),
                        wt.astype(jnp.bfloat16).astype(jnp.float32),
                        bt, ones_n, zeros_n)
    assert out_tb.shape == (Bt, Nt)
    assert out_tb.dtype == jnp.bfloat16
    assert jnp.allclose(out_tb.astype(jnp.float32), ref_tb, atol=3e-2, rtol=3e-2)

    print("KERNEL_OK")
</pallas_src>

<mosaic_0001>
module attributes {stable_mosaic.version = 11 : i64} {
  func.func @_fc_kernel(%arg0: i32, %arg1: i32, %arg2: i32, %arg3: memref<128x128xf32, #tpu.memory_space<vmem>>, %arg4: memref<128x128xbf16, #tpu.memory_space<vmem>>, %arg5: memref<8x128xf32, #tpu.memory_space<vmem>>, %arg6: memref<128x128xf32, #tpu.memory_space<vmem>>) attributes {dimension_semantics = [#tpu.dimension_semantics<parallel>, #tpu.dimension_semantics<parallel>, #tpu.dimension_semantics<arbitrary>], iteration_bounds = array<i64: 1, 1, 1>, scalar_prefetch = 0 : i64, scratch_operands = 0 : i64, tpu.core_type = #tpu.core_type<tc>, window_params = [{transform_indices = @transform_0, window_bounds = array<i64: 128, 128>}, {transform_indices = @transform_1, window_bounds = array<i64: 128, 128>}, {transform_indices = @transform_2, window_bounds = array<i64: 8, 128>}, {transform_indices = @transform_3, window_bounds = array<i64: 128, 128>}]} {
    %c0 = arith.constant 0 : index
    %c0_0 = arith.constant 0 : index
    %0 = vector.load %arg3[%c0, %c0_0] : memref<128x128xf32, #tpu.memory_space<vmem>>, vector<128x128xf32>
    %1 = arith.truncf %0 : vector<128x128xf32> to vector<128x128xbf16>
    %c0_1 = arith.constant 0 : index
    %c0_2 = arith.constant 0 : index
    %2 = vector.load %arg4[%c0_1, %c0_2] : memref<128x128xbf16, #tpu.memory_space<vmem>>, vector<128x128xbf16>
    %cst = arith.constant dense<0.000000e+00> : vector<128x128xf32>
    %3 = tpu.matmul %1, %2, %cst {dimension_numbers = #tpu.dot_dimension_numbers<[1], [0], [0], [1], [0, 0, 1, 1], [], []>} : vector<128x128xbf16>, vector<128x128xbf16>, vector<128x128xf32> -> vector<128x128xf32>
    %c0_3 = arith.constant 0 : index
    %c0_4 = arith.constant 0 : index
    %4 = vector.load %arg5[%c0_3, %c0_4] : memref<8x128xf32, #tpu.memory_space<vmem>>, vector<1x128xf32>
    %5 = vector.broadcast %4 : vector<1x128xf32> to vector<128x128xf32>
    %6 = arith.addf %3, %5 : vector<128x128xf32>
    %cst_5 = arith.constant 0.000000e+00 : f32
    %7 = vector.broadcast %cst_5 : f32 to vector<128x128xf32>
    %8 = arith.cmpf ogt, %6, %7 : vector<128x128xf32>
    %cst_6 = arith.constant 0.00999999977 : f32
    %9 = vector.broadcast %cst_6 : f32 to vector<128x128xf32>
    %10 = arith.mulf %9, %6 : vector<128x128xf32>
    %11 = arith.select %8, %6, %10 : vector<128x128xi1>, vector<128x128xf32>
    %c1 = arith.constant 1 : index
    %c0_7 = arith.constant 0 : index
    %12 = vector.load %arg5[%c1, %c0_7] : memref<8x128xf32, #tpu.memory_space<vmem>>, vector<1x128xf32>
    %13 = vector.broadcast %12 : vector<1x128xf32> to vector<128x128xf32>
    %14 = arith.mulf %11, %13 : vector<128x128xf32>
    %c2 = arith.constant 2 : index
    %c0_8 = arith.constant 0 : index
    %15 = vector.load %arg5[%c2, %c0_8] : memref<8x128xf32, #tpu.memory_space<vmem>>, vector<1x128xf32>
    %16 = vector.broadcast %15 : vector<1x128xf32> to vector<128x128xf32>
    %17 = arith.addf %14, %16 : vector<128x128xf32>
    %c0_9 = arith.constant 0 : index
    %c0_10 = arith.constant 0 : index
    %18 = vector.load %arg6[%c0_9, %c0_10] : memref<128x128xf32, #tpu.memory_space<vmem>>, vector<128x128xf32>
    tpu.vector_store %arg6[%c0_9, %c0_10], %17 {strides = array<i32>} : memref<128x128xf32, #tpu.memory_space<vmem>>, vector<128x128xf32>,
    return
  }
  func.func @transform_0(%arg0: i32, %arg1: i32, %arg2: i32) -> (i32, i32) {
    %c0_i32 = arith.constant 0 : i32
    return %arg0, %arg2 : i32, i32
  }
  func.func @transform_1(%arg0: i32, %arg1: i32, %arg2: i32) -> (i32, i32) {
    %c0_i32 = arith.constant 0 : i32
    return %arg2, %arg1 : i32, i32
  }
  func.func @transform_2(%arg0: i32, %arg1: i32, %arg2: i32) -> (i32, i32) {
    %c0_i32 = arith.constant 0 : i32
    %c0_i32_0 = arith.constant 0 : i32
    return %c0_i32, %arg1 : i32, i32
  }
  func.func @transform_3(%arg0: i32, %arg1: i32, %arg2: i32) -> (i32, i32) {
    %c0_i32 = arith.constant 0 : i32
    return %arg0, %arg1 : i32, i32
  }
}

</mosaic_0001>

<bundles_post_ra>
// kernel: tpu_custom_call.1
= control target key start
LH: loop header
LB: loop body
LE: loop exit
PB: predicated region body
PF: predicated region fallthrough
CT: control target
= control target key end

     0   :  { %8 = vsyncpa [#allocation3], 0  ;;  %s648_s0 = inlined_call_operand.hbm [shape: f32[128,128], index: 0, kind: input, shape index: {}]   ;;  %s649_s1 = inlined_call_operand.hbm [shape: bf16[128,128], index: 1, kind: input, shape index: {}]   ;;  %s650_s2 = inlined_call_operand.hbm [shape: f32[8,128], index: 2, kind: input, shape index: {}]   ;;  %s651_s3 = inlined_call_operand.hbm [shape: f32[128,128], index: 3, kind: output, shape index: {}]  }
   0x1   :  { %9 = vsyncpa [#allocation6], 0 }
   0x2   :  { %10 = vsyncpa [#allocation4], 0  ;;  %s546_s12 = smov [#allocation5]  }
   0x3   :  { %s28_s13 = sshll.u32 %s546_s12, 4  ;;  %s29_s13 = int_to_ptr.vmem [resolvable:$true] %s28_s13 }
   0x4   :  { %s468_s14 = scalar_lea.vmem %s29_s13, 1024  ;;  %p473_p1 = scmp.lt.s32.totalorder %s29_s13, %s29_s13 }
   0x5   :  { %p469_p0 = scmp.ne.s32.totalorder %s29_s13, %s468_s14  ;;  %p474_p2 = scmp.lt.s32.totalorder %s468_s14, %s468_s14 }
   0x7   :  { %p475_p3 = por %p474_p2, %p473_p1 }
   0x9   :  { %p476_p4 = pnand %p475_p3, %p469_p0 }
   0xb   :  { %479 = shalt.err (!%p476_p4)
}
   0xc   :  { %s547_s15 = smov 64   ;;  %s548_s16 = smov 4  }
   0xd   :  { %34 = dma.hbm_to_vmem [thread:$0]  %s649_s1, 1024, %s29_s13, [#allocation6], %s547_s15, %s547_s15, %s548_s16  }
   0xe   :  { %s549_s19 = smov [#allocation2]  }
   0xf   :  { %s16_s20 = sshll.u32 %s549_s19, 4  ;;  %s17_s20 = int_to_ptr.vmem [resolvable:$true] %s16_s20 }
  0x10   :  { %s488_s21 = scalar_lea.vmem %s17_s20, 2048  ;;  %p493_p6 = scmp.lt.s32.totalorder %s17_s20, %s17_s20 }
  0x11   :  { %p489_p5 = scmp.ne.s32.totalorder %s17_s20, %s488_s21  ;;  %p494_p7 = scmp.lt.s32.totalorder %s488_s21, %s488_s21 }
  0x13   :  { %p495_p8 = por %p494_p7, %p493_p6 }
  0x15   :  { %p496_p9 = pnand %p495_p8, %p489_p5 }
  0x17   :  { %499 = shalt.err (!%p496_p9)
}
  0x18   :  { %s550_s22 = smov 128   ;;  %s551_s23 = smov 8  }
  0x19   :  { %22 = dma.hbm_to_vmem [thread:$0]  %s648_s0, 2048, %s17_s20, [#allocation3], %s550_s22, %s550_s22, %s551_s23  }
  0x1a   :  { %s552_s1 = smov [#allocation7]  }
  0x1b   :  { %s41_s26 = sshll.u32 %s552_s1, 4  ;;  %s42_s26 = int_to_ptr.vmem [resolvable:$true] %s41_s26 }
  0x1c   :  { %s508_s27 = scalar_lea.vmem %s42_s26, 128  ;;  %p513_p11 = scmp.lt.s32.totalorder %s42_s26, %s42_s26 }
  0x1d   :  { %p509_p10 = scmp.ne.s32.totalorder %s42_s26, %s508_s27  ;;  %p514_p12 = scmp.lt.s32.totalorder %s508_s27, %s508_s27 }
  0x1f   :  { %p515_p13 = por %p514_p12, %p513_p11 }
  0x21   :  { %p516_p0 = pnand %p515_p13, %p509_p10 }
  0x23   :  { %519 = shalt.err (!%p516_p0)
}
  0x24   :  { %44 = dma.hbm_to_vmem [thread:$0]  %s650_s2, 128, %s42_s26, [#allocation6]  }
  0x25   :  { %540 = dma.done.wait [#allocation3], 2048  }
  0x26   :  { %541 = vsyncadd [#allocation3], 4294965248 }
  0x27   :  { %542 = dma.done.wait [#allocation6], 1152  }
  0x28   :  { %543 = vsyncadd [#allocation6], 4294966144  ;;  %v452_v0 = vld [vmem:[#allocation5 + $0x38] sm:$0xff]   ;;  %v453_v1 = vld [vmem:[#allocation5 + $0x30] sm:$0xff]   ;;  %s553_s0 = smov [#allocation8]  }
  0x29   :  { %396 = vmatprep.subr.bf16.mxu0 %v452_v0  ;;  %428 = vmatprep.subr.bf16.mxu1 %v452_v0  ;;  %v454_v2 = vld [vmem:[#allocation5 + $0x28] sm:$0xff]   ;;  %v455_v3 = vld [vmem:[#allocation5 + $0x20] sm:$0xff]   ;;  %v456_v10 = vld [vmem:[#allocation5 + $0x18] sm:$0xff]   ;;  %s356_s2 = sshll.u32 %s553_s0, 4  ;;  %s357_s2 = int_to_ptr.vmem [resolvable:$true] %s356_s2 }
  0x2a   :  { %397 = vmatpush3.bf16.msra.mxu0 %v452_v0  ;;  %436 = vmatpush3.bf16.msra.mxu1 %v452_v0  ;;  %v55_v4 = vld [vmem:[#allocation2] sm:$0xff]  ;;  %v56_v5 = vld [vmem:[#allocation2 + $0x8] sm:$0xff]  ;;  %v457_v11 = vld [vmem:[#allocation5 + $0x10] sm:$0xff]   ;;  %s520_s30 = scalar_lea.vmem %s357_s2, 2048  ;;  %p525_p2 = scmp.lt.s32.totalorder %s357_s2, %s357_s2 }
  0x2b   :  { %398 = vmatprep.subr.bf16.mxu0 %v453_v1  ;;  %429 = vmatprep.subr.bf16.mxu1 %v453_v1  ;;  %v63_v6 = vld [vmem:[#allocation2 + $0x40] sm:$0xff]  ;;  %v71_v7 = vpack.c.bf16 %v56_v5, %v55_v4  ;;  %v64_v8 = vld [vmem:[#allocation2 + $0x48] sm:$0xff]  ;;  %v57_v14 = vld [vmem:[#allocation2 + $0x10] sm:$0xff]  ;;  %p521_p1 = scmp.ne.s32.totalorder %s357_s2, %s520_s30  ;;  %p526_p3 = scmp.lt.s32.totalorder %s520_s30, %s520_s30 }
  0x2c   :  { %v75_v9 = vpack.c.bf16 %v64_v8, %v63_v6  ;;  %v458_v12 = vld [vmem:[#allocation5 + $0x8] sm:$0xff]   ;;  %v459_v13 = vld [vmem:[#allocation5] sm:$0xff]   ;;  %v58_v15 = vld [vmem:[#allocation2 + $0x18] sm:$0xff] }
  0x2d   :  { %412 = vmatprep.mubr.bf16.mxu0 %v71_v7  ;;  %v65_v16 = vld [vmem:[#allocation2 + $0x50] sm:$0xff]  ;;  %v66_v17 = vld [vmem:[#allocation2 + $0x58] sm:$0xff]  ;;  %v59_v18 = vld [vmem:[#allocation2 + $0x20] sm:$0xff]  ;;  %v72_v22 = vpack.c.bf16 %v58_v15, %v57_v14  ;;  %p527_p4 = por %p526_p3, %p525_p2 }
  0x2e   :  { %399 = vmatpush3.bf16.msra.mxu0 %v453_v1  ;;  %437 = vmatpush3.bf16.msra.mxu1 %v453_v1  ;;  %v60_v19 = vld [vmem:[#allocation2 + $0x28] sm:$0xff]  ;;  %v67_v20 = vld [vmem:[#allocation2 + $0x60] sm:$0xff]  ;;  %v76_v23 = vpack.c.bf16 %v66_v17, %v65_v16  ;;  %v61_v26 = vld [vmem:[#allocation2 + $0x30] sm:$0xff] }
  0x2f   :  { %400 = vmatprep.subr.bf16.mxu0 %v454_v2  ;;  %430 = vmatprep.subr.bf16.mxu1 %v454_v2  ;;  %v68_v21 = vld [vmem:[#allocation2 + $0x68] sm:$0xff]  ;;  %v73_v24 = vpack.c.bf16 %v60_v19, %v59_v18  ;;  %v62_v27 = vld [vmem:[#allocation2 + $0x38] sm:$0xff]  ;;  %v69_v28 = vld [vmem:[#allocation2 + $0x70] sm:$0xff]  ;;  %p528_p5 = pnand %p527_p4, %p521_p1 }
  0x30   :  { %420 = vmatprep.mubr.bf16.mxu1 %v75_v9  ;;  %v77_v25 = vpack.c.bf16 %v68_v21, %v67_v20  ;;  %v70_v29 = vld [vmem:[#allocation2 + $0x78] sm:$0xff]  ;;  %v74_v30 = vpack.c.bf16 %v62_v27, %v61_v26  ;;  %v586_v32 = vld [vmem:[#allocation7] ss:$0 sm:$0xff]  ;;  %v590_v37 = vld [vmem:[#allocation7 + $0x1] ss:$0 sm:$0xff] }
  0x31   :  { %v78_v31 = vpack.c.bf16 %v70_v29, %v69_v28  ;;  %v594_v47 = vld [vmem:[#allocation7 + $0x2] ss:$0 sm:$0xff] }
  0x32   :  { %401 = vmatpush3.bf16.msra.mxu0 %v454_v2  ;;  %438 = vmatpush3.bf16.msra.mxu1 %v454_v2 }
  0x33   :  { %402 = vmatprep.subr.bf16.mxu0 %v455_v3  ;;  %431 = vmatprep.subr.bf16.mxu1 %v455_v3 }
  0x36   :  { %403 = vmatpush3.bf16.msra.mxu0 %v455_v3  ;;  %439 = vmatpush3.bf16.msra.mxu1 %v455_v3 }
  0x37   :  { %404 = vmatprep.subr.bf16.mxu0 %v456_v10  ;;  %432 = vmatprep.subr.bf16.mxu1 %v456_v10 }
  0x3a   :  { %405 = vmatpush3.bf16.msra.mxu0 %v456_v10  ;;  %440 = vmatpush3.bf16.msra.mxu1 %v456_v10 }
  0x3b   :  { %406 = vmatprep.subr.bf16.mxu0 %v457_v11  ;;  %433 = vmatprep.subr.bf16.mxu1 %v457_v11 }
  0x3e   :  { %407 = vmatpush3.bf16.msra.mxu0 %v457_v11  ;;  %441 = vmatpush3.bf16.msra.mxu1 %v457_v11 }
  0x3f   :  { %408 = vmatprep.subr.bf16.mxu0 %v458_v12  ;;  %434 = vmatprep.subr.bf16.mxu1 %v458_v12 }
  0x42   :  { %409 = vmatpush3.bf16.msra.mxu0 %v458_v12  ;;  %442 = vmatpush3.bf16.msra.mxu1 %v458_v12 }
  0x43   :  { %410 = vmatprep.subr.bf16.mxu0 %v459_v13  ;;  %435 = vmatprep.subr.bf16.mxu1 %v459_v13 }
  0x46   :  { %411 = vmatpush3.bf16.msra.mxu0 %v459_v13  ;;  %443 = vmatpush3.bf16.msra.mxu1 %v459_v13 }
  0x49   :  { %413 = vmatmul.mubr.bf16.vlgmr.msra.gmra.mxu0 %v72_v22  ;;  %421 = vmatmul.mubr.bf16.vlgmr.msra.gmra.mxu1 %v76_v23 }
  0x4a   :  { %416 = vmatprep.mubr.bf16.mxu0 %v73_v24  ;;  %424 = vmatprep.mubr.bf16.mxu1 %v77_v25 }
  0x51   :  { %417 = vmatmul.mubr.bf16.gmra.mxu0 %v74_v30  ;;  %425 = vmatmul.mubr.bf16.gmra.mxu1 %v78_v31 }
 0x109   :  { %v414_v33 = vpop.f32.mrf.mxu0  ;;  %v422_v34 = vpop.f32.mrf.mxu1 }
 0x10a   :  { %v191_v35 = vadd.f32 %v414_v33, %v586_v32  ;;  %v223_v36 = vadd.f32 %v422_v34, %v586_v32 }
 0x10b   :  { %v182_v38 = vpop.f32.mrf.mxu0  ;;  %v214_v39 = vpop.f32.mrf.mxu1 }
 0x10c   :  { %vm247_vm0 = vcmp.gt.f32.partialorder %v191_v35, 0.0  ;;  %v263_v40 = vmul.f32 0.01, %v191_v35  ;;  %vm255_vm1 = vcmp.gt.f32.partialorder %v223_v36, 0.0  ;;  %v271_v41 = vmul.f32 0.01, %v223_v36 }
 0x10d   :  { %v183_v42 = vadd.f32 %v586_v32, %v182_v38  ;;  %v215_v43 = vadd.f32 %v586_v32, %v214_v39  ;;  %v415_v44 = vpop.f32.mrf.mxu0  ;;  %v423_v45 = vpop.f32.mrf.mxu1 }
 0x10e   :  { %v279_v46 = vsel %vm247_vm0, %v191_v35, %v263_v40  ;;  %v287_v48 = vsel %vm255_vm1, %v223_v36, %v271_v41  ;;  %v194_v49 = vadd.f32 %v415_v44, %v586_v32  ;;  %v226_v50 = vadd.f32 %v423_v45, %v586_v32 }
 0x10f   :  { %v300_v51 = vmul.f32 %v590_v37, %v279_v46  ;;  %v308_v52 = vmul.f32 %v590_v37, %v287_v48  ;;  %vm245_vm2 = vcmp.gt.f32.partialorder %v183_v42, 0.0  ;;  %v261_v53 = vmul.f32 0.01, %v183_v42  ;;  %v185_v54 = vpop.f32.mrf.mxu0  ;;  %v217_v55 = vpop.f32.mrf.mxu1 }
 0x110   :  { %vm253_vm3 = vcmp.gt.f32.partialorder %v215_v43, 0.0  ;;  %v269_v56 = vmul.f32 0.01, %v215_v43  ;;  %vm248_vm4 = vcmp.gt.f32.partialorder %v194_v49, 0.0  ;;  %v264_v57 = vmul.f32 0.01, %v194_v49 }
 0x111   :  { %v321_v58 = vadd.f32 %v594_v47, %v300_v51  ;;  %v329_v59 = vadd.f32 %v594_v47, %v308_v52  ;;  %v277_v60 = vsel %vm245_vm2, %v183_v42, %v261_v53  ;;  %vm256_vm5 = vcmp.gt.f32.partialorder %v226_v50, 0.0  ;;  %v418_v61 = vpop.f32.mrf.mxu0  ;;  %v426_v62 = vpop.f32.mrf.mxu1 }
 0x112   :  { %v298_v63 = vmul.f32 %v590_v37, %v277_v60  ;;  %v285_v0 = vsel %vm253_vm3, %v215_v43, %v269_v56  ;;  %v280_v1 = vsel %vm248_vm4, %v194_v49, %v264_v57  ;;  %v272_v2 = vmul.f32 0.01, %v226_v50 }
 0x113   :  { %337 = vst [vmem:[#allocation8 + $0x10] sm:$0xff] %v321_v58  ;;  %345 = vst [vmem:[#allocation8 + $0x50] sm:$0xff] %v329_v59  ;;  %v306_v3 = vmul.f32 %v590_v37, %v285_v0  ;;  %v301_v4 = vmul.f32 %v590_v37, %v280_v1  ;;  %v186_v5 = vadd.f32 %v586_v32, %v185_v54  ;;  %v198_v7 = vpop.f32.mrf.mxu0  ;;  %v230_v8 = vpop.f32.mrf.mxu1 }
 0x114   :  { %v218_v6 = vadd.f32 %v586_v32, %v217_v55  ;;  %v319_v9 = vadd.f32 %v594_v47, %v298_v63  ;;  %v288_v10 = vsel %vm256_vm5, %v226_v50, %v272_v2  ;;  %v207_v11 = vadd.f32 %v418_v61, %v586_v32 }
 0x115   :  { %v239_v12 = vadd.f32 %v426_v62, %v586_v32  ;;  %v327_v13 = vadd.f32 %v594_v47, %v306_v3  ;;  %v322_v14 = vadd.f32 %v594_v47, %v301_v4  ;;  %v309_v15 = vmul.f32 %v590_v37, %v288_v10  ;;  %v419_v18 = vpop.f32.mrf.mxu0  ;;  %v427_v22 = vpop.f32.mrf.mxu1 }
 0x116   :  { %vm246_vm6 = vcmp.gt.f32.partialorder %v186_v5, 0.0  ;;  %335 = vst [vmem:[#allocation8] sm:$0xff] %v319_v9  ;;  %v262_v16 = vmul.f32 0.01, %v186_v5  ;;  %vm254_vm7 = vcmp.gt.f32.partialorder %v218_v6, 0.0  ;;  %vm251_vm8 = vcmp.gt.f32.partialorder %v207_v11, 0.0 }
 0x117   :  { %v270_v17 = vmul.f32 0.01, %v218_v6  ;;  %343 = vst [vmem:[#allocation8 + $0x40] sm:$0xff] %v327_v13  ;;  %338 = vst [vmem:[#allocation8 + $0x18] sm:$0xff] %v322_v14  ;;  %v330_v19 = vadd.f32 %v594_v47, %v309_v15  ;;  %v267_v20 = vmul.f32 0.01, %v207_v11  ;;  %v199_v25 = vadd.f32 %v586_v32, %v198_v7  ;;  %v201_v35 = vpop.f32.mrf.mxu0  ;;  %v233_v40 = vpop.f32.mrf.mxu1 }
 0x118   :  { %vm259_vm9 = vcmp.gt.f32.partialorder %v239_v12, 0.0  ;;  %v275_v21 = vmul.f32 0.01, %v239_v12  ;;  %v278_v23 = vsel %vm246_vm6, %v186_v5, %v262_v16  ;;  %v231_v26 = vadd.f32 %v586_v32, %v230_v8 }
 0x119   :  { %v286_v24 = vsel %vm254_vm7, %v218_v6, %v270_v17  ;;  %346 = vst [vmem:[#allocation8 + $0x58] sm:$0xff] %v330_v19  ;;  %v299_v27 = vmul.f32 %v590_v37, %v278_v23  ;;  %v283_v29 = vsel %vm251_vm8, %v207_v11, %v267_v20  ;;  %vm249_vm10 = vcmp.gt.f32.partialorder %v199_v25, 0.0 }
 0x11a   :  { %v307_v28 = vmul.f32 %v590_v37, %v286_v24  ;;  %v291_v30 = vsel %vm259_vm9, %v239_v12, %v275_v21  ;;  %v304_v31 = vmul.f32 %v590_v37, %v283_v29  ;;  %v265_v34 = vmul.f32 0.01, %v199_v25 }
 0x11b   :  { %v312_v33 = vmul.f32 %v590_v37, %v291_v30  ;;  %v320_v36 = vadd.f32 %v594_v47, %v299_v27  ;;  %vm257_vm11 = vcmp.gt.f32.partialorder %v231_v26, 0.0  ;;  %v273_v39 = vmul.f32 0.01, %v231_v26 }
 0x11c   :  { %v328_v38 = vadd.f32 %v594_v47, %v307_v28  ;;  %v325_v41 = vadd.f32 %v594_v47, %v304_v31  ;;  %v281_v43 = vsel %vm249_vm10, %v199_v25, %v265_v34  ;;  %v210_v44 = vadd.f32 %v419_v18, %v586_v32 }
 0x11d   :  { %v333_v42 = vadd.f32 %v594_v47, %v312_v33  ;;  %336 = vst [vmem:[#allocation8 + $0x8] sm:$0xff] %v320_v36  ;;  %v302_v45 = vmul.f32 %v590_v37, %v281_v43  ;;  %v289_v46 = vsel %vm257_vm11, %v231_v26, %v273_v39  ;;  %v242_v48 = vadd.f32 %v427_v22, %v586_v32 }
 0x11e   :  { %344 = vst [vmem:[#allocation8 + $0x48] sm:$0xff] %v328_v38  ;;  %v202_v49 = vadd.f32 %v586_v32, %v201_v35  ;;  %341 = vst [vmem:[#allocation8 + $0x30] sm:$0xff] %v325_v41  ;;  %v310_v50 = vmul.f32 %v590_v37, %v289_v46  ;;  %vm252_vm12 = vcmp.gt.f32.partialorder %v210_v44, 0.0  ;;  %v268_v51 = vmul.f32 0.01, %v210_v44 }
 0x11f   :  { %349 = vst [vmem:[#allocation8 + $0x70] sm:$0xff] %v333_v42  ;;  %v234_v52 = vadd.f32 %v586_v32, %v233_v40  ;;  %v323_v53 = vadd.f32 %v594_v47, %v302_v45  ;;  %vm260_vm13 = vcmp.gt.f32.partialorder %v242_v48, 0.0  ;;  %v276_v54 = vmul.f32 0.01, %v242_v48 }
 0x120   :  { %vm250_vm14 = vcmp.gt.f32.partialorder %v202_v49, 0.0  ;;  %v331_v55 = vadd.f32 %v594_v47, %v310_v50  ;;  %v284_v56 = vsel %vm252_vm12, %v210_v44, %v268_v51  ;;  %v266_v57 = vmul.f32 0.01, %v202_v49 }
 0x121   :  { %vm258_vm15 = vcmp.gt.f32.partialorder %v234_v52, 0.0  ;;  %339 = vst [vmem:[#allocation8 + $0x20] sm:$0xff] %v323_v53  ;;  %v305_v58 = vmul.f32 %v590_v37, %v284_v56  ;;  %v292_v59 = vsel %vm260_vm13, %v242_v48, %v276_v54  ;;  %v274_v60 = vmul.f32 0.01, %v234_v52 }
 0x122   :  { %347 = vst [vmem:[#allocation8 + $0x60] sm:$0xff] %v331_v55  ;;  %v313_v61 = vmul.f32 %v590_v37, %v292_v59  ;;  %v282_v62 = vsel %vm250_vm14, %v202_v49, %v266_v57 }
 0x123   :  { %v326_v32 = vadd.f32 %v594_v47, %v305_v58  ;;  %v303_v63 = vmul.f32 %v590_v37, %v282_v62  ;;  %v290_v0 = vsel %vm258_vm15, %v234_v52, %v274_v60 }
 0x124   :  { %v334_v1 = vadd.f32 %v594_v47, %v313_v61  ;;  %v311_v2 = vmul.f32 %v590_v37, %v290_v0 }
 0x125   :  { %342 = vst [vmem:[#allocation8 + $0x38] sm:$0xff] %v326_v32  ;;  %v324_v3 = vadd.f32 %v594_v47, %v303_v63 }
 0x126   :  { %350 = vst [vmem:[#allocation8 + $0x78] sm:$0xff] %v334_v1  ;;  %v332_v4 = vadd.f32 %v594_v47, %v311_v2 }
 0x127   :  { %340 = vst [vmem:[#allocation8 + $0x28] sm:$0xff] %v324_v3 }
 0x128   :  { %348 = vst [vmem:[#allocation8 + $0x68] sm:$0xff] %v332_v4 }
 0x129   :  { %531 = shalt.err (!%p528_p5)
}
 0x12a   :  { %362 = dma.vmem_to_hbm [thread:$0]  %s357_s2, 2048, %s651_s3, [#allocation4], %s550_s22, %s550_s22, %s551_s23  }
 0x12b   :  { %544 = dma.done.wait [#allocation4], 2048  }
 0x12c   :  { %545 = vsyncadd [#allocation4], 4294965248 }
 0x12d   :  { %366 = vsyncpa [#allocation3], 1 }
 0x12e   :  { %367 = vsyncpa [#allocation6], 1 }
 0x12f   :  { %368 = vsyncpa [#allocation4], 1 }

</bundles_post_ra>
